<compile_context>
chip_gen: v7x
topology: tpu7x:2x2x1
jax: 0.10.0
libtpu: 0.0.40
codegen_flags: <defaults>
</compile_context>

<pallas_src>
import functools

import numpy as np
import jax
import jax.numpy as jnp
from jax.experimental import pallas as pl
from jax.experimental.pallas import tpu as pltpu

# COCO 17-keypoint sigmas (OKSLoss.__init__, num_keypoints=17)
SIGMAS_17 = np.array(
    [0.26, 0.25, 0.25, 0.35, 0.35, 0.79, 0.79, 0.72, 0.72,
     0.62, 0.62, 1.07, 1.07, 0.87, 0.87, 0.89, 0.89],
    dtype=np.float32) / 10.0


def _round_up(x, m):
    return ((x + m - 1) // m) * m


def _oks_loss_kernel(coords_ref, vld_ref, area_ref, out_ref, *,
                     linear, eps, loss_weight, n_valid, tile_n):
    """One batch tile of loss_weight * oks_loss.

    coords : (4, K, T)  pred_x, pred_y, tgt_x, tgt_y, pre-scaled by
                        sqrt(1 / (2 * (2*sigma)^2)); K on sublanes, T on lanes.
    vld    : (K, T)     visibility flags.
    area   : (1, T)     target areas (lane-dense).
    out    : (1, T)     lane-dense per-sample loss (padded lanes zeroed).
    """
    p_x = coords_ref[0].astype(jnp.float32)                      # (K, T)
    p_y = coords_ref[1].astype(jnp.float32)
    t_x = coords_ref[2].astype(jnp.float32)
    t_y = coords_ref[3].astype(jnp.float32)
    v = vld_ref[...].astype(jnp.float32)                         # (K, T)
    area = area_ref[...].astype(jnp.float32)                     # (1, T)

    dx = p_x - t_x
    dy = p_y - t_y
    # Already includes the 1/(2*var_k) factor via the pre-scaled coordinates.
    sq = dx * dx + dy * dy                                       # (K, T)

    inv_area = pl.reciprocal(area, approx=False)                 # (1, T)
    sd1 = jnp.exp(-(sq * inv_area)) * v                          # (K, T)

    num = jnp.sum(sd1, axis=0, keepdims=True)                    # (1, T)
    den = jnp.sum(v, axis=0, keepdims=True) + 1e-6               # (1, T)
    oks = jnp.maximum(num * pl.reciprocal(den, approx=False), eps)
    loss = (1.0 - oks) if linear else -jnp.log(oks)
    loss = loss_weight * loss

    # Zero lanes beyond the true batch size (garbage from the partial block).
    col = pl.program_id(0) * tile_n + jax.lax.broadcasted_iota(
        jnp.int32, (1, tile_n), 1)
    out_ref[...] = jnp.where(col < n_valid, loss, 0.0)


def oks_loss_pallas(pred, target, valid, area, *, sigmas=SIGMAS_17,
                    linear=False, eps=1e-6, loss_weight=1.0, max_tile_n=8192):
    """Equivalent of OKSLoss.forward(pred, target, valid, area) with
    weight=None / avg_factor=None / reduction_override=None, which returns the
    un-reduced per-sample loss of shape (n,)."""
    n, twoK = pred.shape
    K = twoK // 2
    assert target.shape == (n, twoK) and valid.shape == (n, K)
    assert area.shape == (n,)

    # Per-keypoint scale sqrt(1 / (2 * (2*sigma)^2)) folded into the coordinate
    # slab (part of the same fused relayout -> no extra HBM pass, no in-kernel
    # per-keypoint operand).
    scale_np = (1.0 / (2.0 * np.sqrt(2.0, dtype=np.float32) *
                       np.asarray(sigmas, np.float32))).astype(np.float32)
    scale = jnp.asarray(scale_np, dtype=pred.dtype)

    # Single relayout: (n, 2K) x2 -> (4, K, n) slab.  Keeps the input dtype
    # (no forced bf16->f32 upcast in HBM); the kernel casts blocks to f32.
    coords = jnp.concatenate(
        [pred.reshape(n, K, 2), target.reshape(n, K, 2)], axis=-1)  # (n, K, 4)
    coords = coords * scale[None, :, None]
    coords = jnp.transpose(coords, (2, 1, 0))                       # (4, K, n)
    valid_t = jnp.transpose(valid)                                   # (K, n)
    area_r = area.reshape(1, n)                                      # (1, n)

    # Batch tiling: lane dim must be a multiple of 128 (or the full dim).
    # Keep >= 2 grid steps whenever n > 128 so v7x can use both TensorCores.
    if n <= 128:
        tile_n = n
    else:
        tile_n = min(int(max_tile_n), _round_up(pl.cdiv(n, 2), 128))
    num_tiles = pl.cdiv(n, tile_n)
    n_out = num_tiles * tile_n   # output over-allocated; no partial writes

    kern = functools.partial(_oks_loss_kernel, linear=bool(linear),
                             eps=float(eps), loss_weight=float(loss_weight),
                             n_valid=n, tile_n=tile_n)

    out = pl.pallas_call(
        kern,
        grid=(num_tiles,),
        in_specs=[
            pl.BlockSpec((4, K, tile_n), lambda i: (0, 0, i)),   # coords slab
            pl.BlockSpec((K, tile_n), lambda i: (0, i)),         # valid
            pl.BlockSpec((1, tile_n), lambda i: (0, i)),         # area
        ],
        out_specs=pl.BlockSpec((1, tile_n), lambda i: (0, i)),
        out_shape=jax.ShapeDtypeStruct((1, n_out), jnp.float32),
        compiler_params=pltpu.CompilerParams(
            dimension_semantics=("parallel",)),
    )(coords, valid_t, area_r)

    return out[0, :n]


def oks_loss_ref(pred, target, valid, area, *, sigmas=SIGMAS_17,
                 linear=False, eps=1e-6, loss_weight=1.0):
    """Pure-JAX reference matching the PyTorch module."""
    n, twoK = pred.shape
    K = twoK // 2
    var = (jnp.asarray(sigmas, jnp.float32) * 2.0) ** 2
    kp = pred.reshape(n, K, 2).astype(jnp.float32)
    kg = target.reshape(n, K, 2).astype(jnp.float32)
    sq = (kp[:, :, 0] - kg[:, :, 0]) ** 2 + (kp[:, :, 1] - kg[:, :, 1]) ** 2
    sq0 = sq / (area.astype(jnp.float32)[:, None] * var[None, :] * 2.0)
    sd1 = jnp.exp(-sq0) * valid.astype(jnp.float32)
    oks = sd1.sum(axis=1) / (valid.astype(jnp.float32).sum(axis=1) + 1e-6)
    oks = jnp.maximum(oks, eps)
    loss = (1.0 - oks) if linear else -jnp.log(oks)
    return loss_weight * loss


if __name__ == "__main__":
    key = jax.random.PRNGKey(0)

    def make_inputs(k, n, K=17):
        k1, k2, k3, k4 = jax.random.split(k, 4)
        pred = jax.random.normal(k1, (n, 2 * K), dtype=jnp.float32)
        target = jax.random.normal(k2, (n, 2 * K), dtype=jnp.float32)
        valid = (jax.random.uniform(k3, (n, K)) > 0.3).astype(jnp.float32)
        area = jax.random.uniform(k4, (n,), minval=0.5, maxval=2.0,
                                  dtype=jnp.float32)
        return pred, target, valid, area

    # Small shape matching the module (num_keypoints=17 -> pred/target (n, 34)),
    # plus one non-divisible case exercising the 2-step grid, the partial last
    # block and the in-kernel lane mask.
    for n, linear in ((6, False), (6, True), (700, False)):
        pred, target, valid, area = make_inputs(
            jax.random.fold_in(key, 2 * n + int(linear)), n)
        out = jax.block_until_ready(
            oks_loss_pallas(pred, target, valid, area,
                            linear=linear, eps=1e-6, loss_weight=1.0))
        ref = oks_loss_ref(pred, target, valid, area,
                           linear=linear, eps=1e-6, loss_weight=1.0)
        np.testing.assert_allclose(np.asarray(out), np.asarray(ref),
                                   rtol=1e-5, atol=1e-5)

    print("KERNEL_OK")
</pallas_src>

<mosaic_0001>
module attributes {stable_mosaic.version = 11 : i64} {
  func.func @_oks_loss_kernel(%arg0: i32, %arg1: memref<4x17x6xf32, #tpu.memory_space<vmem>>, %arg2: memref<17x6xf32, #tpu.memory_space<vmem>>, %arg3: memref<1x6xf32, #tpu.memory_space<vmem>>, %arg4: memref<1x6xf32, #tpu.memory_space<vmem>>) attributes {dimension_semantics = [#tpu.dimension_semantics<parallel>], iteration_bounds = array<i64: 1>, scalar_prefetch = 0 : i64, scratch_operands = 0 : i64, tpu.core_type = #tpu.core_type<tc>, window_params = [{transform_indices = @transform_0, window_bounds = array<i64: 4, 17, 6>}, {transform_indices = @transform_1, window_bounds = array<i64: 17, 6>}, {transform_indices = @transform_2, window_bounds = array<i64: 1, 6>}, {transform_indices = @transform_3, window_bounds = array<i64: 1, 6>}]} {
    %c0 = arith.constant 0 : index
    %c0_0 = arith.constant 0 : index
    %c0_1 = arith.constant 0 : index
    %0 = vector.load %arg1[%c0, %c0_0, %c0_1] : memref<4x17x6xf32, #tpu.memory_space<vmem>>, vector<1x17x6xf32>
    %1 = vector.shape_cast %0 : vector<1x17x6xf32> to vector<17x6xf32>
    %c1 = arith.constant 1 : index
    %c0_2 = arith.constant 0 : index
    %c0_3 = arith.constant 0 : index
    %2 = vector.load %arg1[%c1, %c0_2, %c0_3] : memref<4x17x6xf32, #tpu.memory_space<vmem>>, vector<1x17x6xf32>
    %3 = vector.shape_cast %2 : vector<1x17x6xf32> to vector<17x6xf32>
    %c2 = arith.constant 2 : index
    %c0_4 = arith.constant 0 : index
    %c0_5 = arith.constant 0 : index
    %4 = vector.load %arg1[%c2, %c0_4, %c0_5] : memref<4x17x6xf32, #tpu.memory_space<vmem>>, vector<1x17x6xf32>
    %5 = vector.shape_cast %4 : vector<1x17x6xf32> to vector<17x6xf32>
    %c3 = arith.constant 3 : index
    %c0_6 = arith.constant 0 : index
    %c0_7 = arith.constant 0 : index
    %6 = vector.load %arg1[%c3, %c0_6, %c0_7] : memref<4x17x6xf32, #tpu.memory_space<vmem>>, vector<1x17x6xf32>
    %7 = vector.shape_cast %6 : vector<1x17x6xf32> to vector<17x6xf32>
    %c0_8 = arith.constant 0 : index
    %c0_9 = arith.constant 0 : index
    %8 = vector.load %arg2[%c0_8, %c0_9] : memref<17x6xf32, #tpu.memory_space<vmem>>, vector<17x6xf32>
    %c0_10 = arith.constant 0 : index
    %c0_11 = arith.constant 0 : index
    %9 = vector.load %arg3[%c0_10, %c0_11] : memref<1x6xf32, #tpu.memory_space<vmem>>, vector<1x6xf32>
    %10 = arith.subf %1, %5 : vector<17x6xf32>
    %11 = arith.subf %3, %7 : vector<17x6xf32>
    %12 = arith.mulf %10, %10 : vector<17x6xf32>
    %13 = arith.mulf %11, %11 : vector<17x6xf32>
    %14 = arith.addf %12, %13 : vector<17x6xf32>
    %15 = tpu.reciprocal %9 : vector<1x6xf32> -> vector<1x6xf32>
    %16 = vector.broadcast %15 : vector<1x6xf32> to vector<17x6xf32>
    %17 = arith.mulf %14, %16 : vector<17x6xf32>
    %cst = arith.constant 0.000000e+00 : f32
    %18 = vector.broadcast %cst : f32 to vector<17x6xf32>
    %19 = arith.subf %18, %17 : vector<17x6xf32>
    %20 = math.exp %19 : vector<17x6xf32>
    %21 = arith.mulf %20, %8 : vector<17x6xf32>
    %cst_12 = arith.constant dense<0.000000e+00> : vector<6xf32>
    %22 = vector.multi_reduction <add>, %21, %cst_12 [0] : vector<17x6xf32> to vector<6xf32>
    %23 = vector.shape_cast %22 : vector<6xf32> to vector<1x6xf32>
    %cst_13 = arith.constant dense<0.000000e+00> : vector<6xf32>
    %24 = vector.multi_reduction <add>, %8, %cst_13 [0] : vector<17x6xf32> to vector<6xf32>
    %25 = vector.shape_cast %24 : vector<6xf32> to vector<1x6xf32>
    %cst_14 = arith.constant 9.99999997E-7 : f32
    %26 = vector.broadcast %cst_14 : f32 to vector<1x6xf32>
    %27 = arith.addf %25, %26 : vector<1x6xf32>
    %28 = tpu.reciprocal %27 : vector<1x6xf32> -> vector<1x6xf32>
    %29 = arith.mulf %23, %28 : vector<1x6xf32>
    %cst_15 = arith.constant 9.99999997E-7 : f32
    %30 = vector.broadcast %cst_15 : f32 to vector<1x6xf32>
    %31 = arith.maximumf %29, %30 : vector<1x6xf32>
    %32 = math.log %31 : vector<1x6xf32>
    %cst_16 = arith.constant 0.000000e+00 : f32
    %33 = vector.broadcast %cst_16 : f32 to vector<1x6xf32>
    %34 = arith.subf %33, %32 : vector<1x6xf32>
    %cst_17 = arith.constant 1.000000e+00 : f32
    %35 = vector.broadcast %cst_17 : f32 to vector<1x6xf32>
    %36 = arith.mulf %35, %34 : vector<1x6xf32>
    %c6_i32 = arith.constant 6 : i32
    %37 = arith.muli %arg0, %c6_i32 : i32
    %38 = tpu.iota {dimensions = array<i32: 1>} : vector<1x6xi32>
    %39 = vector.broadcast %37 : i32 to vector<1x6xi32>
    %40 = arith.addi %39, %38 : vector<1x6xi32>
    %c6_i32_18 = arith.constant 6 : i32
    %41 = vector.broadcast %c6_i32_18 : i32 to vector<1x6xi32>
    %42 = arith.cmpi slt, %40, %41 : vector<1x6xi32>
    %cst_19 = arith.constant 0.000000e+00 : f32
    %43 = vector.broadcast %cst_19 : f32 to vector<1x6xf32>
    %44 = arith.select %42, %36, %43 : vector<1x6xi1>, vector<1x6xf32>
    %c0_20 = arith.constant 0 : index
    %c0_21 = arith.constant 0 : index
    %45 = vector.load %arg4[%c0_20, %c0_21] : memref<1x6xf32, #tpu.memory_space<vmem>>, vector<1x6xf32>
    tpu.vector_store %arg4[%c0_20, %c0_21], %44 {strides = array<i32>} : memref<1x6xf32, #tpu.memory_space<vmem>>, vector<1x6xf32>,
    return
  }
  func.func @transform_0(%arg0: i32) -> (i32, i32, i32) {
    %c0_i32 = arith.constant 0 : i32
    %c0_i32_0 = arith.constant 0 : i32
    %c0_i32_1 = arith.constant 0 : i32
    return %c0_i32, %c0_i32_0, %arg0 : i32, i32, i32
  }
  func.func @transform_1(%arg0: i32) -> (i32, i32) {
    %c0_i32 = arith.constant 0 : i32
    %c0_i32_0 = arith.constant 0 : i32
    return %c0_i32, %arg0 : i32, i32
  }
  func.func @transform_2(%arg0: i32) -> (i32, i32) {
    %c0_i32 = arith.constant 0 : i32
    %c0_i32_0 = arith.constant 0 : i32
    return %c0_i32, %arg0 : i32, i32
  }
  func.func @transform_3(%arg0: i32) -> (i32, i32) {
    %c0_i32 = arith.constant 0 : i32
    %c0_i32_0 = arith.constant 0 : i32
    return %c0_i32, %arg0 : i32, i32
  }
}

</mosaic_0001>

<bundles_post_ra>
// kernel: tpu_custom_call.1
= control target key start
LH: loop header
LB: loop body
LE: loop exit
PB: predicated region body
PF: predicated region fallthrough
CT: control target
= control target key end

     0   :  { %vm71_vm0 = vcmask 48128   ;;  %vm75_vm1 = vcmask 40960   ;;  %v51_v17 = vlaneseq  ;;  %s260_s0 = inlined_call_operand.vmem [shape: f32[4,17,6], index: 0, kind: input, shape index: {}]   ;;  %s261_s1 = inlined_call_operand.vmem [shape: f32[17,6], index: 1, kind: input, shape index: {}]   ;;  %s262_s2 = inlined_call_operand.vmem [shape: f32[1,6], index: 2, kind: input, shape index: {}]   ;;  %s263_s3 = inlined_call_operand.hbm [shape: f32[1,6], index: 3, kind: output, shape index: {}]  }
   0x1   :  { %v15_v0 = vld [vmem:[%s260_s0] sm:$0xff]  ;;  %v16_v1 = vld [vmem:[%s260_s0 + $0x8] sm:$0xff]  ;;  %v17_v2 = vld [vmem:[%s260_s0 + $0x10] sm:$0x1] }
   0x2   :  { %v124_v3 = vld [vmem:[%s260_s0 + $0x18] sm:$0xff]  ;;  %v125_v4 = vld [vmem:[%s260_s0 + $0x20] sm:$0xff]  ;;  %v126_v5 = vld [vmem:[%s260_s0 + $0x28] sm:$0x1] }
   0x3   :  { %v127_v6 = vld [vmem:[%s260_s0 + $0x30] sm:$0xff]  ;;  %v128_v7 = vld [vmem:[%s260_s0 + $0x38] sm:$0xff]  ;;  %v129_v8 = vld [vmem:[%s260_s0 + $0x40] sm:$0x1] }
   0x4   :  { %v130_v9 = vld [vmem:[%s260_s0 + $0x48] sm:$0xff]  ;;  %v131_v10 = vld [vmem:[%s260_s0 + $0x50] sm:$0xff]  ;;  %v132_v11 = vld [vmem:[%s260_s0 + $0x58] sm:$0x1]  ;;  %v34_v16 = vsub.f32 %v15_v0, %v127_v6 }
   0x5   :  { %v30_v12 = vld [vmem:[%s261_s1] sm:$0xff]  ;;  %v31_v13 = vld [vmem:[%s261_s1 + $0x8] sm:$0xff]  ;;  %v32_v14 = vld [vmem:[%s261_s1 + $0x10] sm:$0x1] }
   0x6   :  { %v33_v15 = vld [vmem:[%s262_s2] sm:$0x1]  ;;  %v84_v18 = vsel %vm71_vm0, %v30_v12, 0.0 }
   0x7   :  { %8 = vsyncpa [#allocation3], 0  ;;  %v35_v19 = vsub.f32 %v16_v1, %v128_v7  ;;  %v36_v20 = vsub.f32 %v17_v2, %v129_v8  ;;  %v37_v21 = vsub.f32 %v124_v3, %v130_v9  ;;  %134 = vrcp.f32 %v33_v15  ;;  %s170_s0 = smov [#allocation2]  }
   0x8   :  { %v38_v22 = vsub.f32 %v125_v4, %v131_v10  ;;  %v39_v23 = vsub.f32 %v126_v5, %v132_v11  ;;  %v85_v24 = vsel %vm71_vm0, %v31_v13, 0.0  ;;  %v87_v25 = vsel %vm75_vm1, %v32_v14, 0.0  ;;  %s116_s1 = sshll.u32 %s170_s0, 4  ;;  %s117_s1 = int_to_ptr.vmem [resolvable:$true] %s116_s1 }
   0x9   :  { %v86_v26 = vadd.f32 %v85_v24, %v84_v18  ;;  %v52_v27 = vshrl.u32 %v51_v17, 7  ;;  %v40_v28 = vmul.f32 %v34_v16, %v34_v16  ;;  %v41_v29 = vmul.f32 %v35_v19, %v35_v19  ;;  %s146_s2 = scalar_lea.vmem %s117_s1, 16  ;;  %s150_s17 = scalar_lea.vmem %s117_s1, 32 }
   0xa   :  { %v42_v31 = vmul.f32 %v36_v20, %v36_v20  ;;  %v43_v32 = vmul.f32 %v37_v21, %v37_v21  ;;  %v44_v33 = vmul.f32 %v38_v22, %v38_v22  ;;  %v45_v34 = vmul.f32 %v39_v23, %v39_v23  ;;  %p147_p0 = scmp.ne.s32.totalorder %s117_s1, %s146_s2  ;;  %p151_p1 = scmp.lt.s32.totalorder %s117_s1, %s117_s1 }
   0xb   :  { %v88_v30 = vadd.f32 %v87_v25, %v86_v26  ;;  %v53_v35 = vsub.s32 0, %v52_v27  ;;  %p152_p2 = scmp.lt.s32.totalorder %s150_s17, %s146_s2 }
   0xc   :  { %v46_v37 = vadd.f32 %v43_v32, %v40_v28  ;;  %v47_v38 = vadd.f32 %v44_v33, %v41_v29  ;;  %v48_v39 = vadd.f32 %v45_v34, %v42_v31 }
   0xd   :  { %v89_v36 = vrot.slane %v88_v30, 4  ;;  %p153_p3 = por %p152_p2, %p151_p1 }
   0xf   :  { %v90_v42 = vadd.f32 %v89_v36, %v88_v30  ;;  %p154_p4 = pnand %p153_p3, %p147_p0 }
  0x11   :  { %v135_v40 = vpop.eup %134  ;;  %v91_v49 = vrot.slane %v90_v42, 2 }
  0x12   :  { %v54_v41 = vrot.slane %v135_v40, %v53_v35 }
  0x13   :  { %v92_v53 = vadd.f32 %v91_v49, %v90_v42 }
  0x14   :  { %v56_v43 = vmul.f32 %v54_v41, %v46_v37  ;;  %v57_v44 = vmul.f32 %v54_v41, %v47_v38  ;;  %v58_v45 = vmul.f32 %v54_v41, %v48_v39 }
  0x15   :  { %v93_v54 = vrot.slane %v92_v53, 1 }
  0x16   :  { %v59_v46 = vsub.f32 0.0, %v56_v43  ;;  %v60_v47 = vsub.f32 0.0, %v57_v44  ;;  %v61_v48 = vsub.f32 0.0, %v58_v45 }
  0x17   :  { %v94_v56 = vadd.f32 %v93_v54, %v92_v53 }
  0x18   :  { %v62_v50 = vmul.f32 1.442695, %v59_v46  ;;  %v64_v51 = vmul.f32 1.442695, %v60_v47  ;;  %v66_v52 = vmul.f32 1.442695, %v61_v48 }
  0x19   :  { %v95_v0 = vadd.f32 1e-06, %v94_v56 }
  0x1a   :  { %136 = vpow2.f32 %v62_v50 }
  0x1b   :  { %138 = vpow2.f32 %v64_v51 }
  0x1c   :  { %140 = vpow2.f32 %v66_v52 }
  0x1d   :  { %142 = vrcp.f32 %v95_v0 }
  0x24   :  { %v137_v55 = vpop.eup %136 }
  0x25   :  { %v139_v57 = vpop.eup %138  ;;  %v68_v58 = vmul.f32 %v137_v55, %v30_v12 }
  0x26   :  { %v141_v59 = vpop.eup %140  ;;  %v69_v60 = vmul.f32 %v139_v57, %v31_v13  ;;  %v104_v13 = vand.u32 127, %v51_v17 }
  0x27   :  { %v70_v61 = vmul.f32 %v141_v59, %v32_v14  ;;  %v72_v62 = vsel %vm71_vm0, %v68_v58, 0.0  ;;  %v143_v9 = vpop.eup %142 }
  0x28   :  { %v73_v63 = vsel %vm71_vm0, %v69_v60, 0.0  ;;  %vm107_vm2 = vcmp.lt.s32.totalorder %v104_v13, 6 }
  0x29   :  { %v74_v1 = vadd.f32 %v73_v63, %v72_v62  ;;  %v76_v2 = vsel %vm75_vm1, %v70_v61, 0.0 }
  0x2b   :  { %v77_v3 = vadd.f32 %v76_v2, %v74_v1 }
  0x2d   :  { %v78_v4 = vrot.slane %v77_v3, 4 }
  0x2f   :  { %v79_v5 = vadd.f32 %v78_v4, %v77_v3 }
  0x31   :  { %v80_v6 = vrot.slane %v79_v5, 2 }
  0x33   :  { %v81_v7 = vadd.f32 %v80_v6, %v79_v5 }
  0x35   :  { %v82_v8 = vrot.slane %v81_v7, 1 }
  0x37   :  { %v83_v10 = vadd.f32 %v82_v8, %v81_v7 }
  0x39   :  { %v97_v11 = vmul.f32 %v143_v9, %v83_v10 }
  0x3b   :  { %v98_v12 = vmax.f32 %v97_v11, 1e-06 }
  0x3d   :  { %144 = vlog2.f32 %v98_v12 }
  0x47   :  { %v145_v14 = vpop.eup %144 }
  0x48   :  { %v100_v15 = vmul.f32 0.6931472, %v145_v14 }
  0x4a   :  { %v101_v16 = vsub.f32 0.0, %v100_v15 }
  0x4c   :  { %v108_v18 = vsel %vm107_vm2, %v101_v16, 0.0 }
  0x4d   :  { %109 = vst.msk [vmem:[#allocation2] sm:$0x1] %vm75_vm1, %v108_v18 }
  0x4e   :  { %157 = shalt.err (!%p154_p4)
}
  0x4f   :  { %s158_s20 = scalar_lea.hbm %s263_s3, 16 }
  0x50   :  { %p159_p5 = scmp.ne.s32.totalorder %s263_s3, %s158_s20  ;;  %p162_p6 = scmp.lt.u32.totalorder %s158_s20, %s263_s3 }
  0x52   :  { %p164_p7 = pnand %p162_p6, %p159_p5 }
  0x54   :  { %167 = shalt.err (!%p164_p7)
}
  0x55   :  { %119 = dma.vmem_to_hbm [thread:$0]  %s117_s1, 16, %s263_s3, [#allocation3]  }
  0x56   :  { %168 = dma.done.wait [#allocation3], 16  }
  0x57   :  { %169 = vsyncadd [#allocation3], 4294967280 }
  0x58   :  { %123 = vsyncpa [#allocation3], 1 }

</bundles_post_ra>
